<compile_context>
chip_gen: v7x
topology: tpu7x:2x2x1
jax: 0.10.0
libtpu: 0.0.40
codegen_flags: <defaults>
</compile_context>

<pallas_src>
import functools

import jax
import jax.numpy as jnp
from jax.experimental import pallas as pl
from jax.experimental.pallas import tpu as pltpu


def _linear_kernel(x_ref, w_ref, o_ref):
    """One (split, k) grid step: o[c] += W_tile @ x_tile.T (f32 accumulation).

    x_ref: (B, tk)          activation tile (f32 or bf16), cast to bf16 here
    w_ref: (n_rows, tk)     weight tile, native (out, in) layout, K lane-dense, bf16
    o_ref: (1, n_rows, B)   resident f32 partial-sum block for this split
    """
    k = pl.program_id(1)  # K-tile index within the split (sequential reduction)

    @pl.when(k == 0)
    def _init():
        o_ref[...] = jnp.zeros_like(o_ref)

    # In-kernel cast (VPU) hides under the DMA stream; avoids a wrapper-side pass.
    x = x_ref[...].astype(jnp.bfloat16)

    # Contract the lane (K) axis of both tiles on the MXU: (n_rows, tk) x (B, tk)
    # -> (n_rows, B), accumulated in f32 into the resident output block. The x
    # operand (smaller) is the one that gets relayouted for the MXU.
    o_ref[0] += jax.lax.dot_general(
        w_ref[...],
        x,
        dimension_numbers=(((1,), (1,)), ((), ())),
        preferred_element_type=jnp.float32,
    )


def _num_tensorcores():
    """2 on dual-TensorCore chips (v7x), else 1 (v5e/v6e). Best-effort detection."""
    try:
        kind = jax.devices()[0].device_kind.lower()
    except Exception:  # pragma: no cover - detection must never crash the forward
        return 1
    return 2 if ("v7" in kind or "7x" in kind) else 1


def _pick_tk(k_split, target_steps=4, max_tk=32768):
    """Smallest lane-aligned divisor of k_split reaching <= target_steps grid steps,
    otherwise the largest divisor <= max_tk (keeps double-buffered tiles well under
    the 16 MiB default scoped VMEM on v5e)."""
    best = 128
    for cand in range(128, k_split + 1, 128):
        if k_split % cand == 0 and cand <= max_tk:
            best = cand
            if k_split // cand <= target_steps:
                break
    return best


@functools.partial(jax.jit, static_argnames=("output_dim", "tk", "num_splits"))
def linear_classifier_forward(x, w_rows, b_row, *, output_dim=None, tk=None,
                              num_splits=None):
    """y = x @ W.T + b, matching torch.nn.Linear.forward. Fully fused under one jit.

    x:      (B, K)        activations, f32 or bf16 (cast to bf16 inside the kernel)
    w_rows: (n_rows, K)   weight in native torch (out, in) layout, rows zero-padded
                          to a multiple of 16 (full bf16 sublane tile), bf16.
    b_row:  (1, n_rows)   bias, zero-padded to n_rows, float32.
    Returns (B, output_dim) float32 logits.
    """
    B, K = x.shape
    n_rows, K2 = w_rows.shape
    assert K == K2, "x / weight K mismatch"
    assert b_row.shape == (1, n_rows), "bias must be (1, n_rows)"
    if output_dim is None:
        output_dim = n_rows

    if num_splits is None:
        # One K-split per TensorCore; the split only pays off on dual-TC (v7x).
        # TODO(synk): verify in xprof that Mosaic shards the size-2 "parallel"
        # axis across both v7x cores; otherwise switch to pl.core_map.
        num_splits = _num_tensorcores()
    num_splits = max(1, int(num_splits))

    # Pad ragged K (rare) so each split's K range is lane-aligned; zeros don't
    # change the result.
    quantum = 128 * num_splits
    k_padded = ((K + quantum - 1) // quantum) * quantum
    if k_padded != K:
        x = jnp.pad(x, ((0, 0), (0, k_padded - K)))
        w_rows = jnp.pad(w_rows, ((0, 0), (0, k_padded - K)))
        K = k_padded

    k_split = K // num_splits
    if tk is None:
        tk = _pick_tk(k_split)
    assert k_split % tk == 0, "tk must divide K // num_splits"
    assert tk % 128 == 0, "tk must be lane-aligned (multiple of 128)"

    kb = k_split // tk  # K-blocks per split
    grid = (num_splits, kb)

    partials = pl.pallas_call(
        _linear_kernel,
        out_shape=jax.ShapeDtypeStruct((num_splits, n_rows, B), jnp.float32),
        grid_spec=pltpu.PrefetchScalarGridSpec(
            num_scalar_prefetch=0,
            grid=grid,
            in_specs=[
                # activation tile: split c owns K-blocks [c*kb, (c+1)*kb)
                pl.BlockSpec((B, tk), lambda c, k, kb=kb: (0, c * kb + k)),
                # weight tile in native (out, in) layout, K lane-dense
                pl.BlockSpec((n_rows, tk), lambda c, k, kb=kb: (0, c * kb + k)),
            ],
            # one resident f32 accumulator block per split (no HBM traffic per step)
            out_specs=pl.BlockSpec((1, n_rows, B), lambda c, k: (c, 0, 0)),
        ),
        compiler_params=pltpu.CompilerParams(
            dimension_semantics=("parallel", "arbitrary"),
        ),
    )(x, w_rows)

    # Fused epilogue (same jit program): combine per-split partials, transpose the
    # tiny (n_rows, B) result, add the bias exactly once, drop padded output rows.
    y = jnp.sum(partials, axis=0).T + b_row
    return y[:, :output_dim]


def pack_linear_params(w, b, *, row_quantum=16):
    """One-time (init-time) packing of torch-layout nn.Linear parameters.

    Weight stays in native (out, in) layout so K is lane-dense in HBM (no
    128-column padding); rows are zero-padded to a full bf16 sublane tile and
    streamed as bf16. Bias is padded to the same row count and kept f32.
    """
    out_dim, in_dim = w.shape
    n_rows = ((out_dim + row_quantum - 1) // row_quantum) * row_quantum
    w_rows = (
        jnp.zeros((n_rows, in_dim), jnp.bfloat16)
        .at[:out_dim, :]
        .set(w.astype(jnp.bfloat16))
    )
    b_row = jnp.zeros((1, n_rows), jnp.float32).at[0, :out_dim].set(
        b.astype(jnp.float32)
    )
    return w_rows, b_row


if __name__ == "__main__":
    # Small shapes consistent with the module: Linear(input_dim, output_dim).
    batch = 8          # >= 8 rows fills the f32 sublane tile; extra rows ~free
    input_dim = 8192   # small stand-in for the default 122880 (same tiling path)
    output_dim = 3     # module default

    key = jax.random.PRNGKey(0)
    kx, kw, kb = jax.random.split(key, 3)

    # PyTorch-style uniform(-1/sqrt(K), 1/sqrt(K)) init, deterministic.
    bound = float(input_dim) ** -0.5
    w = jax.random.uniform(kw, (output_dim, input_dim), jnp.float32, -bound, bound)
    b = jax.random.uniform(kb, (output_dim,), jnp.float32, -bound, bound)
    x = jax.random.normal(kx, (batch, input_dim), jnp.float32)

    # One-time parameter packing (init-time, not per call).
    w_rows, b_row = pack_linear_params(w, b)

    # tk=2048 -> 4 K-steps per split at this small K, exercising the resident f32
    # accumulation path; for the real 122880-wide model the auto-pick chooses
    # tk=30720 (4 steps on single-TC chips, 2 steps per TensorCore on v7x).
    y = linear_classifier_forward(x, w_rows, b_row, output_dim=output_dim, tk=2048)
    jax.block_until_ready(y)

    # Reference: same math as torch F.linear on the bf16-rounded operands,
    # with f32 accumulation.
    x32 = x.astype(jnp.bfloat16).astype(jnp.float32)
    w32 = w_rows[:output_dim].astype(jnp.float32)
    y_ref = jnp.dot(x32, w32.T, precision=jax.lax.Precision.HIGHEST) + b

    assert y.shape == (batch, output_dim)
    assert jnp.allclose(y, y_ref, atol=2e-3, rtol=2e-3), "mismatch vs reference"

    print("KERNEL_OK")
</pallas_src>

<mosaic_0001>
module attributes {stable_mosaic.version = 11 : i64} {
  func.func @_linear_kernel(%arg0: i32, %arg1: i32, %arg2: memref<8x2048xf32, #tpu.memory_space<vmem>>, %arg3: memref<16x2048xbf16, #tpu.memory_space<vmem>>, %arg4: memref<1x16x8xf32, #tpu.memory_space<vmem>>) attributes {dimension_semantics = [#tpu.dimension_semantics<parallel>, #tpu.dimension_semantics<arbitrary>], iteration_bounds = array<i64: 1, 4>, scalar_prefetch = 0 : i64, scratch_operands = 0 : i64, tpu.core_type = #tpu.core_type<tc>, window_params = [{transform_indices = @transform_0, window_bounds = array<i64: 8, 2048>}, {transform_indices = @transform_1, window_bounds = array<i64: 16, 2048>}, {transform_indices = @transform_2, window_bounds = array<i64: 1, 16, 8>}]} {
    %c0_i32 = arith.constant 0 : i32
    %0 = arith.cmpi eq, %arg1, %c0_i32 : i32
    %1 = arith.extui %0 : i1 to i32
    %c0_i32_0 = arith.constant 0 : i32
    %2 = arith.cmpi ne, %1, %c0_i32_0 : i32
    scf.if %2 {
      %cst_10 = arith.constant 0.000000e+00 : f32
      %13 = vector.broadcast %cst_10 : f32 to vector<1x16x8xf32>
      %c0_11 = arith.constant 0 : index
      %c0_12 = arith.constant 0 : index
      %c0_13 = arith.constant 0 : index
      %14 = vector.load %arg4[%c0_11, %c0_12, %c0_13] : memref<1x16x8xf32, #tpu.memory_space<vmem>>, vector<1x16x8xf32>
      tpu.vector_store %arg4[%c0_11, %c0_12, %c0_13], %13 {strides = array<i32>} : memref<1x16x8xf32, #tpu.memory_space<vmem>>, vector<1x16x8xf32>,
    } else {
    }
    %c0 = arith.constant 0 : index
    %c0_1 = arith.constant 0 : index
    %3 = vector.load %arg2[%c0, %c0_1] : memref<8x2048xf32, #tpu.memory_space<vmem>>, vector<8x2048xf32>
    %4 = arith.truncf %3 : vector<8x2048xf32> to vector<8x2048xbf16>
    %c0_2 = arith.constant 0 : index
    %c0_3 = arith.constant 0 : index
    %c0_4 = arith.constant 0 : index
    %5 = vector.load %arg4[%c0_2, %c0_3, %c0_4] : memref<1x16x8xf32, #tpu.memory_space<vmem>>, vector<1x16x8xf32>
    %6 = vector.shape_cast %5 : vector<1x16x8xf32> to vector<16x8xf32>
    %c0_5 = arith.constant 0 : index
    %c0_6 = arith.constant 0 : index
    %7 = vector.load %arg3[%c0_5, %c0_6] : memref<16x2048xbf16, #tpu.memory_space<vmem>>, vector<16x2048xbf16>
    %cst = arith.constant dense<0.000000e+00> : vector<16x8xf32>
    %8 = tpu.matmul %7, %4, %cst {dimension_numbers = #tpu.dot_dimension_numbers<[1], [1], [0], [0], [0, 0, 1, 0], [], []>} : vector<16x2048xbf16>, vector<8x2048xbf16>, vector<16x8xf32> -> vector<16x8xf32>
    %9 = arith.addf %6, %8 : vector<16x8xf32>
    %c0_7 = arith.constant 0 : index
    %c0_8 = arith.constant 0 : index
    %c0_9 = arith.constant 0 : index
    %10 = vector.load %arg4[%c0_7, %c0_8, %c0_9] : memref<1x16x8xf32, #tpu.memory_space<vmem>>, vector<1x16x8xf32>
    %11 = vector.shape_cast %10 : vector<1x16x8xf32> to vector<16x8xf32>
    %12 = vector.shape_cast %9 : vector<16x8xf32> to vector<1x16x8xf32>
    tpu.vector_store %arg4[%c0_7, %c0_8, %c0_9], %12 {strides = array<i32>} : memref<1x16x8xf32, #tpu.memory_space<vmem>>, vector<1x16x8xf32>,
    return
  }
  func.func @transform_0(%arg0: i32, %arg1: i32) -> (i32, i32) {
    %c4_i32 = arith.constant 4 : i32
    %0 = arith.muli %arg0, %c4_i32 : i32
    %1 = arith.addi %0, %arg1 : i32
    %c0_i32 = arith.constant 0 : i32
    %c0_i32_0 = arith.constant 0 : i32
    return %c0_i32, %1 : i32, i32
  }
  func.func @transform_1(%arg0: i32, %arg1: i32) -> (i32, i32) {
    %c4_i32 = arith.constant 4 : i32
    %0 = arith.muli %arg0, %c4_i32 : i32
    %1 = arith.addi %0, %arg1 : i32
    %c0_i32 = arith.constant 0 : i32
    %c0_i32_0 = arith.constant 0 : i32
    return %c0_i32, %1 : i32, i32
  }
  func.func @transform_2(%arg0: i32, %arg1: i32) -> (i32, i32, i32) {
    %c0_i32 = arith.constant 0 : i32
    %c0_i32_0 = arith.constant 0 : i32
    %c0_i32_1 = arith.constant 0 : i32
    return %arg0, %c0_i32, %c0_i32_0 : i32, i32, i32
  }
}

</mosaic_0001>

<bundles_post_ra>
// kernel: linear_classifier_forward.1
= control target key start
LH: loop header
LB: loop body
LE: loop exit
PB: predicated region body
PF: predicated region fallthrough
CT: control target
= control target key end

     0   :  { %7 = vsyncpa [#allocation3], 0  ;;  %s1260_s0 = inlined_call_operand.hbm [shape: f32[8,8192], index: 0, kind: input, shape index: {}]   ;;  %s1261_s1 = inlined_call_operand.hbm [shape: bf16[16,8192], index: 1, kind: input, shape index: {}]   ;;  %s1262_s2 = inlined_call_operand.vmem [shape: f32[1,16,8], index: 2, kind: output, shape index: {}]  }
   0x1   :  { %9 = vsyncpa [#allocation3 + $0x1], 0 }
   0x2   :  { %10 = vsyncpa [#allocation5], 0 }
   0x3   :  { %12 = vsyncpa [#allocation5 + $0x1], 0  ;;  %s1037_s9 = smov 0   ;;  %s1039_s10 = smov 0  }
   0x4   :  { %s1041_s11 = smov 0   ;;  %s1043_s12 = smov 0  }
   0x5   :  { %s1045_s13 = smov 0   ;;  %s1047_s14 = smov 0  }
   0x6 LB: > { %s802_s15 = sadd.s32 4294967295, %s1014_s14   ;;  %s27_s16 = sadd.s32 1, %s1010_s13  ;;  %s1014_s14 = sphi %s1047_s14, %s18_s14   ;;  %s1010_s13 = sphi %s1045_s13, %s1273_s13   ;;  %s1006_s12 = sphi %s1043_s12, %s1272_s12   ;;  %s1002_s11 = sphi %s1041_s11, %s1271_s11   ;;  %s998_s10 = sphi %s1039_s10, %s1270_s10   ;;  %s994_s9 = sphi %s1037_s9, %s1269_s9  }
   0x7   : > { %p28_p0 = scmp.ge.s32.totalorder %s27_s16, 4  ;;  %s41_s17 = sadd.s32 1, %s1002_s11 }
   0x8   : > { %p48_p1 = scmp.ne.s32.totalorder %s1002_s11, %s998_s10  ;;  %p49_p2 = scmp.eq.s32.totalorder %s1014_s14, 0 }
   0x9   : > { %s1275_s16 = smov (%p28_p0, %s27_s16), 0  ;;  %p54_p4 = scmp.ne.s32.totalorder %s998_s10, %s994_s9 }
   0xa   : > { %p1073_p3 = por %p49_p2, %p48_p1  ;;  %s38_s19 = ssub.s32 %s1010_s13, %s1275_s16 }
   0xb   : > { %p55_p5 = scmp.eq.s32.totalorder %s802_s15, 0  ;;  %p39_p6 = scmp.eq.s32.totalorder %s38_s19, 0 }
   0xc   : > { %p847_p8 = scmp.lt.s32.totalorder %s1014_s14, 4  ;;  %s1089_s22 = sand.u32 1, %s1002_s11  }
   0xd   : > { %p1080_p7 = por %p55_p5, %p54_p4  ;;  %s834_s23 = sshll.u32 %s1010_s13, 11 }
   0xe   : > { %s1086_s21 = scalar_select %p39_p6, %s1002_s11, %s41_s17  }
   0xf   : > { %s1265_s20 = scalar_select %p1080_p7, 1, 0 }
  0x10   : > { %s805_s24 = sshll.u32 %s1089_s22, 7  ;;  %s1096_s27 = scalar_lea.hbm %s1260_s0, %s834_s23 }
  0x11   : > { %s138_s28 = scalar_lea.vmem [#allocation2], %s805_s24  ;;  %p1102_p9 = pnand %p847_p8, %p1073_p3 }
  0x12   : > { %s148_s29 = sshll.u32 %s138_s28, 4  ;;  %s135_s3 = scalar_lea.sflag [#allocation3], %s1089_s22  ;;  %s1106_s29 = int_to_ptr.vmem [resolvable:$true] %s148_s29 }
  0x13   : > { %s900_s4 = scalar_lea.hbm %s1096_s27, 2048  ;;  %p902_p11 = pneg %p1102_p9 }
  0x14   : > { %p901_p10 = scmp.ne.s32.totalorder %s1096_s27, %s900_s4  ;;  %s905_s7 = scalar_lea.hbm %s1260_s0, 8192 }
  0x15   : > { %p906_p0 = scmp.lt.u32.totalorder %s1096_s27, %s1260_s0  ;;  %p907_p1 = scmp.lt.u32.totalorder %s905_s7, %s900_s4 }
  0x16   : > { %p903_p12 = pnand %p902_p11, %p901_p10  ;;  %p909_p3 = scmp.lt.u32.totalorder %s900_s4, %s1096_s27 }
  0x17   : > { %p908_p2 = por %p907_p1, %p906_p0 }
  0x18   : > { %p904_p13 = pneg %p903_p12 }
  0x19   : > { %p910_p4 = por %p909_p3, %p908_p2 }
  0x1b   : > { %p911_p5 = pnand %p910_p4, %p904_p13 }
  0x1d   : > { %914 = shalt.err (!%p911_p5)
}
  0x1e   : > { %s915_s15 = scalar_lea.vmem %s1106_s29, 2048  ;;  %s1016_s17 = smov [#allocation2]  }
  0x1f   : > { %p916_p6 = scmp.ne.s32.totalorder %s1106_s29, %s915_s15  ;;  %s920_s18 = sshll.u32 %s1016_s17, 4  ;;  %s921_s18 = int_to_ptr.vmem [resolvable:$false] %s920_s18 }
  0x20   : > { %s922_s19 = scalar_lea.vmem %s921_s18, 4096  ;;  %p923_p12 = scmp.lt.s32.totalorder %s1106_s29, %s921_s18 }
  0x21   : > { %p918_p8 = pnand %p916_p6, %p902_p11  ;;  %p924_p0 = scmp.lt.s32.totalorder %s922_s19, %s915_s15 }
  0x23   : > { %p919_p10 = pneg %p918_p8  ;;  %p925_p1 = por %p924_p0, %p923_p12 }
  0x25   : > { %p926_p2 = pnand %p925_p1, %p919_p10 }
  0x27   : > { %929 = shalt.err (!%p926_p2)
}
  0x28   : > { %843 = dma.hbm_to_vmem [thread:$0]  (!%p1102_p9), %s1096_s27, 2048, %s1106_s29, %s135_s3  }
  0x29   : > { %s835_s23 = sshll.u32 %s1010_s13, 10  ;;  %s159_s25 = scalar_lea.vmem [#allocation4], %s805_s24 }
  0x2a   : > { %s168_s26 = sshll.u32 %s159_s25, 4  ;;  %p811_p13 = scmp.ge.s32.totalorder %s1014_s14, 1  ;;  %s1137_s26 = int_to_ptr.vmem [resolvable:$true] %s168_s26 }
  0x2b   : > { %p176_p3 = scmp.lt.s32.totalorder %s1014_s14, 5  ;;  %s1144_s5 = scalar_lea.hbm %s1261_s1, %s835_s23 }
  0x2c   : > { %s156_s27 = scalar_lea.sflag [#allocation5], %s1089_s22  ;;  %s930_s24 = scalar_lea.hbm %s1144_s5, 2048 }
  0x2d   : > { %p1146_p4 = pnand %p811_p13, %p176_p3  ;;  %p931_p5 = scmp.ne.s32.totalorder %s1144_s5, %s930_s24 }
  0x2e   : > { %s935_s7 = scalar_lea.hbm %s1261_s1, 8192  ;;  %p936_p10 = scmp.lt.u32.totalorder %s1144_s5, %s1261_s1 }
  0x2f   : > { %p933_p6 = pnand %p931_p5, %p902_p11  ;;  %p937_p12 = scmp.lt.u32.totalorder %s935_s7, %s930_s24 }
  0x30   : > { %p939_p1 = scmp.lt.u32.totalorder %s930_s24, %s1144_s5 }
  0x31   : > { %p934_p8 = pneg %p933_p6  ;;  %p938_p0 = por %p937_p12, %p936_p10 }
  0x33   : > { %p940_p2 = por %p939_p1, %p938_p0 }
  0x35   : > { %p941_p13 = pnand %p940_p2, %p934_p8 }
  0x37   : > { %944 = shalt.err (!%p941_p13)
}
  0x38   : > { %s945_s15 = scalar_lea.vmem %s1137_s26, 2048  ;;  %s1017_s17 = smov [#allocation4]  }
  0x39   : > { %p946_p3 = scmp.ne.s32.totalorder %s1137_s26, %s945_s15  ;;  %s950_s18 = sshll.u32 %s1017_s17, 4  ;;  %s951_s18 = int_to_ptr.vmem [resolvable:$false] %s950_s18 }
  0x3a   : > { %s952_s19 = scalar_lea.vmem %s951_s18, 4096  ;;  %p953_p7 = scmp.lt.s32.totalorder %s1137_s26, %s951_s18 }
  0x3b   : > { %p948_p5 = pnand %p946_p3, %p902_p11  ;;  %p954_p10 = scmp.lt.s32.totalorder %s952_s19, %s945_s15 }
  0x3d   : > { %p949_p6 = pneg %p948_p5  ;;  %p955_p12 = por %p954_p10, %p953_p7 }
  0x3f   : > { %p956_p0 = pnand %p955_p12, %p949_p6 }
  0x41   : > { %959 = shalt.err (!%p956_p0)
}
  0x42   : > { %s1018_s23 = smov 4096   ;;  %s1019_s25 = smov 1024  }
  0x43   : > { %s1020_s28 = smov 64   ;;  %180 = sbr.rel (%p1146_p4) target bundleno = 342 (0x156), region = 28 }
  0x44   : > { %846 = dma.hbm_to_vmem [thread:$0]  (!%p1102_p9), %s1144_s5, 2048, %s1137_s26, %s156_s27, %s1018_s23, %s1019_s25, %s1020_s28  }
  0x45   : > { %s182_s4 = sand.u32 (!%p1146_p4), 1, %s998_s10   ;;  %p1268_p7 = scmp.ne.s32.totalorder (!%p1146_p4), %s1265_s20, 0 }
  0x46   : > { %s812_s24 = sshll.u32 (!%p1146_p4), %s182_s4, 7  ;;  %s183_s29 = scalar_lea.sflag (!%p1146_p4), [#allocation3], %s182_s4 }
  0x47   : > { %s1179_s3 = scalar_lea.vmem (!%p1146_p4), [#allocation2], %s812_s24 }
  0x4a   : > { %985 = dma.done.wait (%p1268_p7), %s183_s29, 2048  }
  0x4b   : > { %987 = vsyncadd (%p1268_p7), %s183_s29, 4294965248  ;;  %s192_s7 = scalar_lea.sflag [#allocation5], %s182_s4  ;;  %s1185_s30 = scalar_lea.vmem [#allocation4], %s812_s24 }
  0x4c   : > { %989 = dma.done.wait (%p1268_p7), %s192_s7, 2048  }
  0x4d   : > { %991 = vsyncadd (%p1268_p7), %s192_s7, 4294965248  ;;  %p814_p9 = scmp.ne.s32.totalorder %s1006_s12, 0 }
  0x4e   : > { %vm237_vm0 = vcmask (!%p814_p9), 64512   ;;  %v1021_v0 = vmov (!%p814_p9), 0.0  }
  0x4f   : > { %236 = sbr.rel (%p814_p9) target bundleno = 86 (0x56), region = 40  ;;  %238 = vst.msk [vmem:[%s1262_s2] sm:$0xff] (!%p814_p9), %vm237_vm0, %v1021_v0  ;;  %239 = vst.msk [vmem:[%s1262_s2 + $0x8] sm:$0xff] (!%p814_p9), %vm237_vm0, %v1021_v0 }
  0x56 PF: > { %v241_v1 = vld [vmem:[%s1179_s3 + $0x8] sm:$0xff]  ;;  %v243_v2 = vld [vmem:[%s1179_s3 + $0x18] sm:$0xff]  ;;  %v240_v3 = vld [vmem:[%s1179_s3] sm:$0xff]  ;;  %vm700_vm1 = vcmask 64512  }
  0x57   : > { %v257_v4 = vpack.c.bf16 %v241_v1, %v241_v1  ;;  %v259_v5 = vpack.c.bf16 %v243_v2, %v243_v2  ;;  %v256_v6 = vpack.c.bf16 %v240_v3, %v240_v3  ;;  %v242_v7 = vld [vmem:[%s1179_s3 + $0x10] sm:$0xff]  ;;  %v274_v8 = vld [vmem:[%s1185_s30] sm:$0xff]  ;;  %v275_v12 = vld [vmem:[%s1185_s30 + $0x8] sm:$0xff] }
  0x58   : > { %v282_v9 = vld [vmem:[%s1185_s30 + $0x40] sm:$0xff]  ;;  %v258_v10 = vpack.c.bf16 %v242_v7, %v242_v7  ;;  %v283_v13 = vld [vmem:[%s1185_s30 + $0x48] sm:$0xff]  ;;  %v247_v17 = vld [vmem:[%s1179_s3 + $0x38] sm:$0xff] }
  0x59   : > { %v816_v11 = vcombine.high %v274_v8, %v282_v9  ;;  %v245_v14 = vld [vmem:[%s1179_s3 + $0x28] sm:$0xff]  ;;  %370 = vmatprep.subr.bf16.mxu0 %v257_v4  ;;  %411 = vmatprep.subr.bf16.mxu1 %v259_v5  ;;  %v818_v15 = vcombine.high %v275_v12, %v283_v13  ;;  %v263_v18 = vpack.c.bf16 %v247_v17, %v247_v17  ;;  %v244_v19 = vld [vmem:[%s1179_s3 + $0x20] sm:$0xff]  ;;  %v246_v20 = vld [vmem:[%s1179_s3 + $0x30] sm:$0xff] }
  0x5a   : > { %v261_v16 = vpack.c.bf16 %v245_v14, %v245_v14  ;;  %371 = vmatpush1.bf16.xpose.msra.mxu0 %v256_v6  ;;  %412 = vmatpush1.bf16.xpose.msra.mxu1 %v258_v10  ;;  %v276_v21 = vld [vmem:[%s1185_s30 + $0x10] sm:$0xff]  ;;  %v277_v23 = vld [vmem:[%s1185_s30 + $0x18] sm:$0xff]  ;;  %v815_v25 = vcombine.low %v274_v8, %v282_v9  ;;  %v817_v26 = vcombine.low %v275_v12, %v283_v13  ;;  %v249_v27 = vld [vmem:[%s1179_s3 + $0x48] sm:$0xff] }
  0x5b   : > { %402 = vmatprep.mubr.bf16.mxu0 %v816_v11  ;;  %443 = vmatprep.mubr.bf16.mxu1 %v818_v15  ;;  %v284_v22 = vld [vmem:[%s1185_s30 + $0x50] sm:$0xff]  ;;  %v285_v24 = vld [vmem:[%s1185_s30 + $0x58] sm:$0xff]  ;;  %v260_v29 = vpack.c.bf16 %v244_v19, %v244_v19  ;;  %v262_v30 = vpack.c.bf16 %v246_v20, %v246_v20  ;;  %v265_v33 = vpack.c.bf16 %v249_v27, %v249_v27  ;;  %v248_v35 = vld [vmem:[%s1179_s3 + $0x40] sm:$0xff] }
  0x5c   : > { %452 = vmatprep.subr.bf16.mxu0 %v261_v16  ;;  %493 = vmatprep.subr.bf16.mxu1 %v263_v18  ;;  %v251_v28 = vld [vmem:[%s1179_s3 + $0x58] sm:$0xff]  ;;  %v820_v31 = vcombine.high %v276_v21, %v284_v22  ;;  %v822_v32 = vcombine.high %v277_v23, %v285_v24  ;;  %v250_v36 = vld [vmem:[%s1179_s3 + $0x50] sm:$0xff]  ;;  %v278_v37 = vld [vmem:[%s1185_s30 + $0x20] sm:$0xff]  ;;  %v819_v41 = vcombine.low %v276_v21, %v284_v22 }
  0x5d   : > { %v267_v34 = vpack.c.bf16 %v251_v28, %v251_v28  ;;  %v286_v38 = vld [vmem:[%s1185_s30 + $0x60] sm:$0xff]  ;;  %v279_v39 = vld [vmem:[%s1185_s30 + $0x28] sm:$0xff]  ;;  %v821_v42 = vcombine.low %v277_v23, %v285_v24  ;;  %v255_v44 = vld [vmem:[%s1179_s3 + $0x78] sm:$0xff]  ;;  %v264_v45 = vpack.c.bf16 %v248_v35, %v248_v35  ;;  %v266_v46 = vpack.c.bf16 %v250_v36, %v250_v36 }
  0x5e   : > { %v287_v40 = vld [vmem:[%s1185_s30 + $0x68] sm:$0xff]  ;;  %v824_v47 = vcombine.high %v278_v37, %v286_v38  ;;  %v271_v50 = vpack.c.bf16 %v255_v44, %v255_v44  ;;  %v252_v51 = vld [vmem:[%s1179_s3 + $0x60] sm:$0xff]  ;;  %v254_v52 = vld [vmem:[%s1179_s3 + $0x70] sm:$0xff]  ;;  %v823_v57 = vcombine.low %v278_v37, %v286_v38 }
  0x5f   : > { %v253_v43 = vld [vmem:[%s1179_s3 + $0x68] sm:$0xff]  ;;  %v826_v48 = vcombine.high %v279_v39, %v287_v40  ;;  %v280_v53 = vld [vmem:[%s1185_s30 + $0x30] sm:$0xff]  ;;  %v281_v55 = vld [vmem:[%s1185_s30 + $0x38] sm:$0xff]  ;;  %v825_v58 = vcombine.low %v279_v39, %v287_v40  ;;  %v268_v59 = vpack.c.bf16 %v252_v51, %v252_v51  ;;  %v270_v60 = vpack.c.bf16 %v254_v52, %v254_v52 }
  0x60   : > { %v269_v49 = vpack.c.bf16 %v253_v43, %v253_v43  ;;  %v288_v54 = vld [vmem:[%s1185_s30 + $0x70] sm:$0xff]  ;;  %v289_v56 = vld [vmem:[%s1185_s30 + $0x78] sm:$0xff]  ;;  %v272_v40 = vld [vmem:[%s1262_s2] sm:$0xff] }
  0x61   : > { %403 = vmatmul.mubr.bf16.vlgmr.msra.gmra.mrb[0].mxu0 %v815_v25  ;;  %444 = vmatmul.mubr.bf16.vlgmr.msra.gmra.mrb[0].mxu1 %v817_v26  ;;  %v828_v61 = vcombine.high %v280_v53, %v288_v54  ;;  %v830_v62 = vcombine.high %v281_v55, %v289_v56  ;;  %v827_v63 = vcombine.low %v280_v53, %v288_v54 }
  0x62   : > { %453 = vmatpush1.bf16.xpose.msra.mxu0 %v260_v29  ;;  %494 = vmatpush1.bf16.xpose.msra.mxu1 %v262_v30  ;;  %v829_v0 = vcombine.low %v281_v55, %v289_v56 }
  0x63   : > { %484 = vmatprep.mubr.bf16.mxu0 %v820_v31  ;;  %525 = vmatprep.mubr.bf16.mxu1 %v822_v32 }
  0x64   : > { %534 = vmatprep.subr.bf16.mxu0 %v265_v33  ;;  %575 = vmatprep.subr.bf16.mxu1 %v267_v34 }
  0x69   : > { %485 = vmatmul.mubr.bf16.vlgmr.msra.gmra.mrb[4].mxu0 %v819_v41  ;;  %526 = vmatmul.mubr.bf16.vlgmr.msra.gmra.mrb[4].mxu1 %v821_v42 }
  0x6a   : > { %535 = vmatpush1.bf16.xpose.msra.mxu0 %v264_v45  ;;  %576 = vmatpush1.bf16.xpose.msra.mxu1 %v266_v46 }
  0x6b   : > { %566 = vmatprep.mubr.bf16.mxu0 %v824_v47  ;;  %607 = vmatprep.mubr.bf16.mxu1 %v826_v48  ;;  %v273_v47 = vld [vmem:[%s1262_s2 + $0x8] sm:$0xff] }
  0x6c   : > { %616 = vmatprep.subr.bf16.mxu0 %v269_v49  ;;  %657 = vmatprep.subr.bf16.mxu1 %v271_v50 }
  0x71   : > { %567 = vmatmul.mubr.bf16.vlgmr.msra.gmra.mrb[8].mxu0 %v823_v57  ;;  %608 = vmatmul.mubr.bf16.vlgmr.msra.gmra.mrb[8].mxu1 %v825_v58 }
  0x72   : > { %617 = vmatpush1.bf16.xpose.msra.mxu0 %v268_v59  ;;  %658 = vmatpush1.bf16.xpose.msra.mxu1 %v270_v60 }
  0x73   : > { %648 = vmatprep.mubr.bf16.mxu0 %v828_v61  ;;  %689 = vmatprep.mubr.bf16.mxu1 %v830_v62 }
  0x79   : > { %649 = vmatmul.mubr.bf16.vlgmr.msra.gmra.mrb[12].mxu0 %v827_v63  ;;  %690 = vmatmul.mubr.bf16.vlgmr.msra.gmra.mrb[12].mxu1 %v829_v0 }
 0x134   : > { %v404_v1 = vpop.f32.mrb[0].mxu0  ;;  %v445_v2 = vpop.f32.mrb[0].mxu1 }
 0x135   : > { %v446_v3 = vadd.f32 %v445_v2, %v404_v1  ;;  %v406_v4 = vpop.f32.mrb[1].mxu0  ;;  %v447_v5 = vpop.f32.mrb[1].mxu1 }
 0x136   : > { %v407_v6 = vpop.f32.mrb[2].mxu0  ;;  %v448_v7 = vpop.f32.mrb[2].mxu1 }
 0x137   : > { %v449_v8 = vadd.f32 %v448_v7, %v407_v6  ;;  %v409_v9 = vpop.f32.mrb[3].mxu0  ;;  %v450_v10 = vpop.f32.mrb[3].mxu1 }
 0x13c   : > { %v486_v11 = vpop.f32.mrb[4].mxu0  ;;  %v527_v12 = vpop.f32.mrb[4].mxu1 }
 0x13d   : > { %v487_v13 = vadd.f32 %v486_v11, %v446_v3  ;;  %v488_v14 = vpop.f32.mrb[5].mxu0  ;;  %v529_v15 = vpop.f32.mrb[5].mxu1 }
 0x13e   : > { %v489_v16 = vpop.f32.mrb[6].mxu0  ;;  %v530_v17 = vpop.f32.mrb[6].mxu1 }
 0x13f   : > { %v528_v18 = vadd.f32 %v527_v12, %v487_v13  ;;  %v490_v19 = vadd.f32 %v489_v16, %v449_v8  ;;  %v491_v20 = vpop.f32.mrb[7].mxu0  ;;  %v532_v21 = vpop.f32.mrb[7].mxu1 }
 0x141   : > { %v531_v22 = vadd.f32 %v530_v17, %v490_v19 }
 0x144   : > { %v568_v23 = vpop.f32.mrb[8].mxu0  ;;  %v609_v24 = vpop.f32.mrb[8].mxu1 }
 0x145   : > { %v569_v25 = vadd.f32 %v568_v23, %v528_v18  ;;  %v570_v26 = vpop.f32.mrb[9].mxu0  ;;  %v611_v27 = vpop.f32.mrb[9].mxu1 }
 0x146   : > { %v571_v28 = vpop.f32.mrb[10].mxu0  ;;  %v612_v29 = vpop.f32.mrb[10].mxu1 }
 0x147   : > { %v610_v30 = vadd.f32 %v609_v24, %v569_v25  ;;  %v572_v31 = vadd.f32 %v571_v28, %v531_v22  ;;  %v573_v32 = vpop.f32.mrb[11].mxu0  ;;  %v614_v33 = vpop.f32.mrb[11].mxu1 }
 0x149   : > { %v613_v34 = vadd.f32 %v612_v29, %v572_v31 }
 0x14c   : > { %v650_v35 = vpop.f32.mrb[12].mxu0  ;;  %v691_v36 = vpop.f32.mrb[12].mxu1 }
 0x14d   : > { %v651_v37 = vadd.f32 %v650_v35, %v610_v30  ;;  %v652_v38 = vpop.f32.mrb[13].mxu0  ;;  %v693_v39 = vpop.f32.mrb[13].mxu1 }
 0x14e   : > { %v653_v41 = vpop.f32.mrb[14].mxu0  ;;  %v694_v42 = vpop.f32.mrb[14].mxu1 }
 0x14f   : > { %v692_v43 = vadd.f32 %v691_v36, %v651_v37  ;;  %v654_v44 = vadd.f32 %v653_v41, %v613_v34  ;;  %v655_v45 = vpop.f32.mrb[15].mxu0  ;;  %v696_v46 = vpop.f32.mrb[15].mxu1 }
 0x151   : > { %v698_v48 = vadd.f32 %v692_v43, %v272_v40  ;;  %v695_v49 = vadd.f32 %v694_v42, %v654_v44 }
 0x153   : > { %701 = vst.msk [vmem:[%s1262_s2] sm:$0xff] %vm700_vm1, %v698_v48  ;;  %v699_v50 = vadd.f32 %v695_v49, %v273_v47 }
 0x155   : > { %702 = vst.msk [vmem:[%s1262_s2 + $0x8] sm:$0xff] %vm700_vm1, %v699_v50 }
 0x156 PF: > { %s18_s14 = sadd.s32 1, %s1014_s14   ;;  %s1269_s9 = smov %s998_s10 }
 0x157   : > { %p15_p11 = scmp.ge.s32.totalorder %s18_s14, 6   ;;  %s1270_s10 = smov %s1002_s11 }
 0x158   : > { %s1271_s11 = smov %s1086_s21  ;;  %s1272_s12 = smov %s1010_s13 }
 0x159   : > { %s1273_s13 = smov %s1275_s16  ;;  %17 = sbr.rel (!%p15_p11) target bundleno = 6 (0x6), region = 85 }
 0x160   :  { %724 = vsyncpa [#allocation3], 1 }
 0x161   :  { %726 = vsyncpa [#allocation3 + $0x1], 1 }
 0x162   :  { %727 = vsyncpa [#allocation5], 1 }
 0x163   :  { %729 = vsyncpa [#allocation5 + $0x1], 1 }

</bundles_post_ra>
